<compile_context>
chip_gen: v7x
topology: tpu7x:2x2x1
jax: 0.10.0
libtpu: 0.0.40
codegen_flags: <defaults>
</compile_context>

<pallas_src>
import jax
import jax.numpy as jnp
from jax.experimental import pallas as pl
from jax.experimental.pallas import tpu as pltpu


def _concat_rows_kernel(*refs):
    """Copy each input tile into its 128-aligned column slice of the output tile.

    refs = (in_0, ..., in_{n-1}, out); all tiles share the same row count.
    The cast to the output dtype is done here (free under the DMA).  Pure data
    movement — subclasses replace these stores with real compute.
    """
    *in_refs, out_ref = refs
    off = 0
    for r in in_refs:
        f = r.shape[-1]
        out_ref[:, off:off + f] = r[...].astype(out_ref.dtype)
        off += f


def _vmem_budgets():
    """(resident_tile_budget_bytes, vmem_limit_bytes) per TPU generation."""
    phys = 128 * 1024 * 1024  # v5e / v6e default if the query fails
    try:
        info = pltpu.get_tpu_info()
        phys = int(getattr(info, "vmem_capacity_bytes", phys))
    except Exception:
        pass
    # Resident (double-buffered tiles) budget: ~45% of physical VMEM, capped so
    # v5e/v6e (128 MiB) use <=56 MiB and v7x (64 MiB) uses <=~28 MiB.
    resident = min((phys * 45) // 100, 56 << 20)
    # Scoped-VMEM limit handed to Mosaic: resident + headroom for compiler
    # internal scratch, never within 4 MiB of physical.
    limit = int(min(resident + (16 << 20), phys - (4 << 20)))
    return int(resident), limit


def _choose_tile_rows(rows: int, bytes_per_row: int, sublane: int,
                      resident_budget: int) -> int:
    """Largest sublane-aligned row tile whose double-buffered working set fits."""
    max_rows = max(resident_budget // max(2 * bytes_per_row, 1), sublane)
    # Keep >=2 grid tiles for large problems so v7x's two TensorCores both get
    # work on the "parallel" row axis (no-op / still-large tiles on v5e/v6e).
    if rows >= 1024:
        max_rows = min(max_rows, pl.cdiv(rows, 2))
    if max_rows >= rows:
        return rows  # full extent — always a legal block shape
    tb = max((max_rows // sublane) * sublane, sublane)
    # Prefer a tile that divides rows evenly (avoids a ragged masked last tile).
    cand = tb
    for _ in range(64):
        if cand < sublane:
            break
        if rows % cand == 0:
            return cand
        cand -= sublane
    return tb


def _group_features(flats, out_dtype):
    """Group features (order preserved) so every group starts at a 128-aligned
    column offset.  Multi-member groups are pre-merged with one cheap
    jnp.concatenate in the wrapper; singletons are passed through untouched
    (their dtype cast happens in-kernel)."""
    groups, cur, cur_w = [], [], 0
    for f in flats:
        cur.append(f)
        cur_w += int(f.shape[-1])
        if cur_w % 128 == 0:
            groups.append(cur)
            cur, cur_w = [], 0
    if cur:
        groups.append(cur)

    arrays = []
    for g in groups:
        if len(g) == 1:
            arrays.append(g[0])
        else:
            arrays.append(jnp.concatenate([a.astype(out_dtype) for a in g], axis=-1))
    return arrays


def option_selector_rep_state(obs_list, pre_action, use_pallas: bool = True):
    """state = concat(flatten(obs_i)..., pre_action) via a tiled Pallas kernel."""
    batch, seq_len = pre_action.shape[:2]
    rows = batch * seq_len

    # Wrapper-side layout plumbing only (contiguous reshapes are free).
    flats = [o.reshape(rows, -1) for o in obs_list]
    flats.append(pre_action.reshape(rows, -1))
    flats = [f for f in flats if int(f.shape[-1]) > 0]
    out_dtype = jnp.result_type(*[f.dtype for f in flats])
    f_total = sum(int(f.shape[-1]) for f in flats)

    if not use_pallas:
        # Pure memcpy: XLA's concat copy runs at HBM roofline; keep the Pallas
        # path only as the fusion point for real subclass compute.
        out = jnp.concatenate([f.astype(out_dtype) for f in flats], axis=-1)
        return out.reshape(batch, seq_len, f_total)

    groups = _group_features(flats, out_dtype)
    widths = [int(g.shape[-1]) for g in groups]

    out_itemsize = jnp.dtype(out_dtype).itemsize
    min_itemsize = min([jnp.dtype(g.dtype).itemsize for g in groups] + [out_itemsize])
    # Sublane granularity: 8 rows for 32-bit, 16 for bf16, 32 for int8.
    sublane = max(8, 8 * (4 // max(min_itemsize, 1)))

    in_bytes_per_row = sum(w * jnp.dtype(g.dtype).itemsize for w, g in zip(widths, groups))
    out_bytes_per_row = f_total * out_itemsize
    bytes_per_row = in_bytes_per_row + out_bytes_per_row

    resident_budget, vmem_limit = _vmem_budgets()
    tb = _choose_tile_rows(rows, bytes_per_row, sublane, resident_budget)
    grid = (pl.cdiv(rows, tb),)

    in_bytes = rows * in_bytes_per_row
    out_bytes = rows * out_bytes_per_row

    out = pl.pallas_call(
        _concat_rows_kernel,
        out_shape=jax.ShapeDtypeStruct((rows, f_total), out_dtype),
        grid=grid,
        in_specs=[pl.BlockSpec((tb, w), lambda i: (i, 0)) for w in widths],
        out_specs=pl.BlockSpec((tb, f_total), lambda i: (i, 0)),
        compiler_params=pltpu.CompilerParams(
            dimension_semantics=("parallel",),
            vmem_limit_bytes=vmem_limit,
        ),
        cost_estimate=pl.CostEstimate(
            flops=0, transcendentals=0, bytes_accessed=int(in_bytes + out_bytes)
        ),
    )(*groups)

    return out.reshape(batch, seq_len, f_total)


class ModelBaseOptionSelectorRep:
    """JAX/Pallas mirror of the PyTorch base module (no parameters)."""

    def __init__(self, obs_names, obs_shapes, d_action_sizes, c_action_size,
                 is_target, use_dilation, model_abs_dir=None, **kwargs):
        self.use_dilation = use_dilation
        self.obs_names = obs_names
        self.obs_shapes = obs_shapes
        self.d_action_sizes = d_action_sizes
        self.c_action_size = c_action_size
        self.is_target = is_target
        self.model_abs_dir = model_abs_dir
        self._build_model(**kwargs)

    def _build_model(self, **kwargs):
        # Base class builds no parameters.
        pass

    def _get_empty_seq_hidden_state(self, state):
        return jnp.zeros((*state.shape[:-1], 0), dtype=state.dtype)

    def forward(self, obs_list, pre_action, pre_seq_hidden_state,
                pre_termination_mask=None, padding_mask=None):
        # TODO(synk): pre_termination_mask / padding_mask have no defined effect
        # in the base class and are accepted but unused.
        state = option_selector_rep_state(obs_list, pre_action)

        if pre_seq_hidden_state is None:
            seq_hidden_state = self._get_empty_seq_hidden_state(state)
        else:
            # Pure identity contract: return the input directly — zero HBM traffic.
            seq_hidden_state = pre_seq_hidden_state
        return state, seq_hidden_state

    def __call__(self, obs_list, pre_action, pre_seq_hidden_state,
                 pre_termination_mask=None, padding_mask=None):
        return self.forward(obs_list, pre_action, pre_seq_hidden_state,
                            pre_termination_mask, padding_mask)


if __name__ == "__main__":
    key = jax.random.PRNGKey(0)
    batch, seq_len = 2, 8

    # ---------------- Test 1: homogeneous f32 inputs ----------------
    obs_names = ["camera", "ray"]
    obs_shapes = [(4, 16, 16), (32,)]
    d_action_sizes = [3, 2]
    c_action_size = 3
    action_size = sum(d_action_sizes) + c_action_size  # 8
    seq_hidden_shape = (64,)

    k1, k2, k3, k4 = jax.random.split(key, 4)
    obs_list = [
        jax.random.normal(k1, (batch, seq_len, *obs_shapes[0]), dtype=jnp.float32),
        jax.random.normal(k2, (batch, seq_len, *obs_shapes[1]), dtype=jnp.float32),
    ]
    pre_action = jax.random.normal(k3, (batch, seq_len, action_size), dtype=jnp.float32)
    pre_seq_hidden_state = jax.random.normal(
        k4, (batch, seq_len, *seq_hidden_shape), dtype=jnp.float32)
    pre_termination_mask = jnp.zeros((batch,), dtype=bool)
    padding_mask = jnp.zeros((batch, seq_len), dtype=bool)

    model = ModelBaseOptionSelectorRep(
        obs_names, obs_shapes, d_action_sizes, c_action_size,
        is_target=False, use_dilation=False)

    state, seq_hidden = model(obs_list, pre_action, pre_seq_hidden_state,
                              pre_termination_mask, padding_mask)
    state = jax.block_until_ready(state)
    seq_hidden = jax.block_until_ready(seq_hidden)

    ref_state = jnp.concatenate(
        [o.reshape(batch, seq_len, -1) for o in obs_list] + [pre_action], axis=-1)
    assert state.shape == ref_state.shape
    assert state.dtype == ref_state.dtype
    assert bool(jnp.allclose(state, ref_state))
    assert seq_hidden.shape == pre_seq_hidden_state.shape
    assert bool(jnp.allclose(seq_hidden, pre_seq_hidden_state))

    # ---------------- Test 2: mixed-dtype obs (in-kernel cast path) ----------------
    k5, k6, k7, k8 = jax.random.split(jax.random.PRNGKey(1), 4)
    obs_list2 = [
        jax.random.normal(k5, (batch, seq_len, 4, 16, 16), dtype=jnp.float32),
        jax.random.normal(k6, (batch, seq_len, 128), dtype=jnp.bfloat16),
        jax.random.normal(k7, (batch, seq_len, 32), dtype=jnp.float32),
    ]
    pre_action2 = jax.random.normal(k8, (batch, seq_len, action_size), dtype=jnp.float32)

    state2, _ = model(obs_list2, pre_action2, None)
    state2 = jax.block_until_ready(state2)
    ref_state2 = jnp.concatenate(
        [o.reshape(batch, seq_len, -1).astype(jnp.float32) for o in obs_list2]
        + [pre_action2], axis=-1)
    assert state2.shape == ref_state2.shape
    assert state2.dtype == ref_state2.dtype
    assert bool(jnp.allclose(state2, ref_state2))

    print("KERNEL_OK")
</pallas_src>

<mosaic_0001>
module attributes {stable_mosaic.version = 11 : i64} {
  func.func @_concat_rows_kernel(%arg0: i32, %arg1: memref<16x1024xf32, #tpu.memory_space<vmem>>, %arg2: memref<16x40xf32, #tpu.memory_space<vmem>>, %arg3: memref<16x1064xf32, #tpu.memory_space<vmem>>) attributes {dimension_semantics = [#tpu.dimension_semantics<parallel>], iteration_bounds = array<i64: 1>, scalar_prefetch = 0 : i64, scratch_operands = 0 : i64, tpu.core_type = #tpu.core_type<tc>, window_params = [{transform_indices = @transform_0, window_bounds = array<i64: 16, 1024>}, {transform_indices = @transform_1, window_bounds = array<i64: 16, 40>}, {transform_indices = @transform_2, window_bounds = array<i64: 16, 1064>}]} {
    %c0 = arith.constant 0 : index
    %c0_0 = arith.constant 0 : index
    %0 = vector.load %arg1[%c0, %c0_0] : memref<16x1024xf32, #tpu.memory_space<vmem>>, vector<16x1024xf32>
    %c0_1 = arith.constant 0 : index
    %c0_2 = arith.constant 0 : index
    %1 = vector.load %arg3[%c0_1, %c0_2] : memref<16x1064xf32, #tpu.memory_space<vmem>>, vector<16x1024xf32>
    tpu.vector_store %arg3[%c0_1, %c0_2], %0 {strides = array<i32>} : memref<16x1064xf32, #tpu.memory_space<vmem>>, vector<16x1024xf32>,
    %c0_3 = arith.constant 0 : index
    %c0_4 = arith.constant 0 : index
    %2 = vector.load %arg2[%c0_3, %c0_4] : memref<16x40xf32, #tpu.memory_space<vmem>>, vector<16x40xf32>
    %c0_5 = arith.constant 0 : index
    %c1024 = arith.constant 1024 : index
    %3 = vector.load %arg3[%c0_5, %c1024] : memref<16x1064xf32, #tpu.memory_space<vmem>>, vector<16x40xf32>
    tpu.vector_store %arg3[%c0_5, %c1024], %2 {strides = array<i32>} : memref<16x1064xf32, #tpu.memory_space<vmem>>, vector<16x40xf32>,
    return
  }
  func.func @transform_0(%arg0: i32) -> (i32, i32) {
    %c0_i32 = arith.constant 0 : i32
    %c0_i32_0 = arith.constant 0 : i32
    return %arg0, %c0_i32 : i32, i32
  }
  func.func @transform_1(%arg0: i32) -> (i32, i32) {
    %c0_i32 = arith.constant 0 : i32
    %c0_i32_0 = arith.constant 0 : i32
    return %arg0, %c0_i32 : i32, i32
  }
  func.func @transform_2(%arg0: i32) -> (i32, i32) {
    %c0_i32 = arith.constant 0 : i32
    %c0_i32_0 = arith.constant 0 : i32
    return %arg0, %c0_i32 : i32, i32
  }
}

</mosaic_0001>

<bundles_post_ra>
// kernel: tpu_custom_call.1
= control target key start
LH: loop header
LB: loop body
LE: loop exit
PB: predicated region body
PF: predicated region fallthrough
CT: control target
= control target key end

     0   :  { %7 = vsyncpa [#allocation3], 0  ;;  %s238_s0 = inlined_call_operand.hbm [shape: f32[16,1024], index: 0, kind: input, shape index: {}]   ;;  %s239_s1 = inlined_call_operand.hbm [shape: f32[16,40], index: 1, kind: input, shape index: {}]   ;;  %s240_s2 = inlined_call_operand.hbm [shape: f32[16,1064], index: 2, kind: output, shape index: {}]  }
   0x1   :  { %8 = vsyncpa [#allocation6], 0 }
   0x2   :  { %9 = vsyncpa [#allocation4], 0  ;;  %s176_s9 = smov [#allocation2]   ;;  %s104_s13 = scalar_lea.hbm %s238_s0, 2048 }
   0x3   :  { %s15_s10 = sshll.u32 %s176_s9, 4  ;;  %p105_p0 = scmp.ne.s32.totalorder %s238_s0, %s104_s13  ;;  %s16_s10 = int_to_ptr.vmem [resolvable:$true] %s15_s10 }
   0x4   :  { %p108_p1 = scmp.lt.u32.totalorder %s104_s13, %s238_s0 }
   0x6   :  { %p110_p2 = pnand %p108_p1, %p105_p0 }
   0x8   :  { %113 = shalt.err (!%p110_p2)
}
   0x9   :  { %s114_s18 = scalar_lea.vmem %s16_s10, 2048  ;;  %p119_p4 = scmp.lt.s32.totalorder %s16_s10, %s16_s10 }
   0xa   :  { %p115_p3 = scmp.ne.s32.totalorder %s16_s10, %s114_s18  ;;  %p120_p5 = scmp.lt.s32.totalorder %s114_s18, %s114_s18 }
   0xc   :  { %p121_p6 = por %p120_p5, %p119_p4 }
   0xe   :  { %p122_p7 = pnand %p121_p6, %p115_p3 }
  0x10   :  { %125 = shalt.err (!%p122_p7)
}
  0x11   :  { %s177_s19 = smov 1024   ;;  %s178_s20 = smov 64  }
  0x12   :  { %21 = dma.hbm_to_vmem [thread:$0]  %s238_s0, 2048, %s16_s10, [#allocation3], %s177_s19, %s177_s19, %s178_s20  }
  0x13   :  { %s179_s23 = smov [#allocation5]   ;;  %s126_s27 = scalar_lea.hbm %s239_s1, 256 }
  0x14   :  { %s27_s24 = sshll.u32 %s179_s23, 4  ;;  %p127_p8 = scmp.ne.s32.totalorder %s239_s1, %s126_s27  ;;  %s28_s24 = int_to_ptr.vmem [resolvable:$true] %s27_s24 }
  0x15   :  { %p130_p9 = scmp.lt.u32.totalorder %s126_s27, %s239_s1 }
  0x17   :  { %p132_p10 = pnand %p130_p9, %p127_p8 }
  0x19   :  { %135 = shalt.err (!%p132_p10)
}
  0x1a   :  { %s136_s4 = scalar_lea.vmem %s28_s24, 256  ;;  %p141_p12 = scmp.lt.s32.totalorder %s28_s24, %s28_s24 }
  0x1b   :  { %p137_p11 = scmp.ne.s32.totalorder %s28_s24, %s136_s4  ;;  %p142_p13 = scmp.lt.s32.totalorder %s136_s4, %s136_s4 }
  0x1d   :  { %p143_p0 = por %p142_p13, %p141_p12 }
  0x1f   :  { %p144_p1 = pnand %p143_p0, %p137_p11 }
  0x21   :  { %147 = shalt.err (!%p144_p1)
}
  0x22   :  { %s180_s0 = smov 128   ;;  %s181_s5 = smov 8  }
  0x23   :  { %33 = dma.hbm_to_vmem [thread:$0]  %s239_s1, 256, %s28_s24, [#allocation6], %s180_s0, %s180_s0, %s181_s5  }
  0x24   :  { %170 = dma.done.wait [#allocation3], 2048  }
  0x25   :  { %171 = vsyncadd [#allocation3], 4294965248 }
  0x26   :  { %172 = dma.done.wait [#allocation6], 256  }
  0x27   :  { %173 = vsyncadd [#allocation6], 4294967040  ;;  %v40_v0 = vld [vmem:[#allocation2] sm:$0xff]  ;;  %v41_v1 = vld [vmem:[#allocation2 + $0x8] sm:$0xff]  ;;  %s182_s8 = smov [#allocation7]   ;;  %vm74_vm0 = vcmask 326656  }
  0x28   :  { %v42_v2 = vld [vmem:[#allocation2 + $0x10] sm:$0xff]  ;;  %56 = vst [vmem:[#allocation7] sm:$0xff] %v40_v0  ;;  %57 = vst [vmem:[#allocation7 + $0x8] sm:$0xff] %v41_v1  ;;  %v43_v3 = vld [vmem:[#allocation2 + $0x18] sm:$0xff]  ;;  %s82_s9 = sshll.u32 %s182_s8, 4  ;;  %s83_s9 = int_to_ptr.vmem [resolvable:$true] %s82_s9 }
  0x29   :  { %58 = vst [vmem:[#allocation7 + $0x10] sm:$0xff] %v42_v2  ;;  %v44_v4 = vld [vmem:[#allocation2 + $0x20] sm:$0xff]  ;;  %v45_v5 = vld [vmem:[#allocation2 + $0x28] sm:$0xff]  ;;  %59 = vst [vmem:[#allocation7 + $0x18] sm:$0xff] %v43_v3  ;;  %s148_s1 = scalar_lea.vmem %s83_s9, 2304  ;;  %p153_p3 = scmp.lt.s32.totalorder %s83_s9, %s83_s9 }
  0x2a   :  { %60 = vst [vmem:[#allocation7 + $0x20] sm:$0xff] %v44_v4  ;;  %61 = vst [vmem:[#allocation7 + $0x28] sm:$0xff] %v45_v5  ;;  %v46_v6 = vld [vmem:[#allocation2 + $0x30] sm:$0xff]  ;;  %v47_v7 = vld [vmem:[#allocation2 + $0x38] sm:$0xff]  ;;  %p149_p2 = scmp.ne.s32.totalorder %s83_s9, %s148_s1  ;;  %p154_p4 = scmp.lt.s32.totalorder %s148_s1, %s148_s1 }
  0x2b   :  { %v48_v8 = vld [vmem:[#allocation2 + $0x40] sm:$0xff]  ;;  %62 = vst [vmem:[#allocation7 + $0x30] sm:$0xff] %v46_v6  ;;  %63 = vst [vmem:[#allocation7 + $0x38] sm:$0xff] %v47_v7  ;;  %v49_v9 = vld [vmem:[#allocation2 + $0x48] sm:$0xff] }
  0x2c   :  { %64 = vst [vmem:[#allocation7 + $0x48] sm:$0xff] %v48_v8  ;;  %v50_v10 = vld [vmem:[#allocation2 + $0x50] sm:$0xff]  ;;  %v51_v11 = vld [vmem:[#allocation2 + $0x58] sm:$0xff]  ;;  %65 = vst [vmem:[#allocation7 + $0x50] sm:$0xff] %v49_v9  ;;  %p155_p5 = por %p154_p4, %p153_p3 }
  0x2d   :  { %66 = vst [vmem:[#allocation7 + $0x58] sm:$0xff] %v50_v10  ;;  %67 = vst [vmem:[#allocation7 + $0x60] sm:$0xff] %v51_v11  ;;  %v52_v12 = vld [vmem:[#allocation2 + $0x60] sm:$0xff]  ;;  %v53_v13 = vld [vmem:[#allocation2 + $0x68] sm:$0xff] }
  0x2e   :  { %v54_v14 = vld [vmem:[#allocation2 + $0x70] sm:$0xff]  ;;  %68 = vst [vmem:[#allocation7 + $0x68] sm:$0xff] %v52_v12  ;;  %69 = vst [vmem:[#allocation7 + $0x70] sm:$0xff] %v53_v13  ;;  %v55_v15 = vld [vmem:[#allocation2 + $0x78] sm:$0xff]  ;;  %p156_p6 = pnand %p155_p5, %p149_p2 }
  0x2f   :  { %70 = vst [vmem:[#allocation7 + $0x78] sm:$0xff] %v54_v14  ;;  %v72_v16 = vld [vmem:[#allocation5] sm:$0xff]  ;;  %v73_v17 = vld [vmem:[#allocation5 + $0x8] sm:$0xff]  ;;  %71 = vst [vmem:[#allocation7 + $0x80] sm:$0xff] %v55_v15 }
  0x30   :  { %75 = vst.msk [vmem:[#allocation7 + $0x40] sm:$0xff] %vm74_vm0, %v72_v16  ;;  %76 = vst.msk [vmem:[#allocation7 + $0x88] sm:$0xff] %vm74_vm0, %v73_v17 }
  0x31   :  { %159 = shalt.err (!%p156_p6)
}
  0x32   :  { %s160_s12 = scalar_lea.hbm %s240_s2, 2304 }
  0x33   :  { %p161_p7 = scmp.ne.s32.totalorder %s240_s2, %s160_s12  ;;  %p164_p8 = scmp.lt.u32.totalorder %s160_s12, %s240_s2 }
  0x35   :  { %p166_p9 = pnand %p164_p8, %p161_p7 }
  0x37   :  { %169 = shalt.err (!%p166_p9)
}
  0x38   :  { %s183_s17 = smov 1152   ;;  %s184_s18 = smov 72  }
  0x39   :  { %88 = dma.vmem_to_hbm [thread:$0]  %s83_s9, 2304, %s240_s2, [#allocation4], %s183_s17, %s183_s17, %s184_s18  }
  0x3a   :  { %174 = dma.done.wait [#allocation4], 2304  }
  0x3b   :  { %175 = vsyncadd [#allocation4], 4294964992 }
  0x3c   :  { %92 = vsyncpa [#allocation3], 1 }
  0x3d   :  { %93 = vsyncpa [#allocation6], 1 }
  0x3e   :  { %94 = vsyncpa [#allocation4], 1 }

</bundles_post_ra>
